<compile_context>
chip_gen: v6e
topology: v6e:2x2x1
jax: 0.10.0
libtpu: 0.0.40
codegen_flags: <defaults>
</compile_context>

<pallas_src>
import functools
import math

import jax
import jax.numpy as jnp
from jax import lax
from jax.experimental import pallas as pl
from jax.experimental.pallas import tpu as pltpu


# --------------------------- Fused MHA kernel --------------------------------

def _fused_mha_kernel(x_ref, wqkv_ref, bqkv_ref, wproj_ref, bproj_ref,
                      cos_ref, sin_ref, o_ref, *, num_heads, head_size):
    # Per grid step (one batch element):
    #   x_ref    : (T, C)     f32
    #   wqkv_ref : (C, 3C)    bf16   bqkv_ref : (1, 3C) f32
    #   wproj_ref: (C, C)     bf16   bproj_ref: (1, C)  f32
    #   cos_ref  : (T, hs)    f32    sin_ref  : (T, hs) f32 (sign-folded)
    #   o_ref    : (T, C)     f32
    T, C = x_ref.shape
    hs = head_size
    half = hs // 2

    # ---- fused QKV projection (bf16 on the MXU, f32 accumulation) ----
    x_bf = x_ref[...].astype(jnp.bfloat16)
    qkv = jnp.dot(x_bf, wqkv_ref[...], preferred_element_type=jnp.float32)
    qkv = qkv + bqkv_ref[...]                               # (T, 3C) f32

    cos = cos_ref[...]                                      # (T, hs)
    sin_s = sin_ref[...]                                    # sin * [-1...,+1...]

    # Causal mask, computed once and shared across heads (hoisted broadcast).
    row = lax.broadcasted_iota(jnp.int32, (T, T), 0)
    col = lax.broadcasted_iota(jnp.int32, (T, T), 1)
    causal = col <= row

    y_heads = []
    for h in range(num_heads):                              # static unroll
        lo = h * hs
        qh = qkv[:, lo:lo + hs]                             # (T, hs) f32
        kh = qkv[:, C + lo:C + lo + hs]
        vh = qkv[:, 2 * C + lo:2 * C + lo + hs]

        # RoPE (rotate-half):  x*cos + rotate_half(x)*sin
        #   rotate_half(x) = roll(x, hs//2) * sign  (sign folded into sin_s)
        # The 1/sqrt(hs) attention scale is pre-folded into the q columns of
        # wqkv / bqkv on the host side, so no extra multiply is needed here.
        qr = qh * cos + pltpu.roll(qh, shift=half, axis=1) * sin_s
        kr = kh * cos + pltpu.roll(kh, shift=half, axis=1) * sin_s

        # scores = qr @ kr^T on the MXU (bf16 operands, f32 accumulation)
        s = lax.dot_general(qr.astype(jnp.bfloat16), kr.astype(jnp.bfloat16),
                            (((1,), (1,)), ((), ())),
                            preferred_element_type=jnp.float32)   # (T, T)

        # causal softmax, kept in f32 (mask constant must stay f32)
        s = jnp.where(causal, s, -1e30)
        m = jnp.max(s, axis=-1, keepdims=True)
        p = jnp.exp(s - m)
        denom = jnp.sum(p, axis=-1, keepdims=True)

        yh = jnp.dot(p.astype(jnp.bfloat16), vh.astype(jnp.bfloat16),
                     preferred_element_type=jnp.float32)          # (T, hs)
        # reciprocal-multiply (EUP slot) instead of a broadcast divide (VALU)
        yh = yh * pl.reciprocal(denom, approx=True)
        y_heads.append(yh)

    y = jnp.concatenate(y_heads, axis=1)                          # (T, C) f32

    # ---- output projection (bf16 on the MXU, f32 accumulation) ----
    out = jnp.dot(y.astype(jnp.bfloat16), wproj_ref[...],
                  preferred_element_type=jnp.float32) + bproj_ref[...]
    o_ref[...] = out.astype(o_ref.dtype)


# ------------------------------- Glue (JAX) ----------------------------------

def rope_tables(T, head_size, base=10000.0):
    half = head_size // 2
    inv_freq = 1.0 / (base ** (jnp.arange(half, dtype=jnp.float32) / half))
    t = jnp.arange(T, dtype=jnp.float32)
    ang = t[:, None] * inv_freq[None, :]                    # (T, half)
    ang = jnp.concatenate([ang, ang], axis=-1)              # (T, hs)
    cos = jnp.cos(ang)
    sin = jnp.sin(ang)
    sign = jnp.concatenate(
        [-jnp.ones((half,), jnp.float32), jnp.ones((half,), jnp.float32)])
    return cos, sin * sign


def custom_mha_forward(x, params, num_heads, head_size):
    """Pallas implementation of CustomMultiHeadedAttention.forward (eval mode)."""
    B, T, C = x.shape
    assert C == num_heads * head_size
    scale = 1.0 / math.sqrt(head_size)

    cos, sin_signed = rope_tables(T, head_size)

    # Fold the 1/sqrt(hs) attention scale into the q columns of the fused QKV
    # weight & bias (host-side, one-time; scaling done in f32 before the bf16
    # cast so relative precision is preserved).
    col_scale = jnp.concatenate(
        [jnp.full((C,), scale, jnp.float32), jnp.ones((2 * C,), jnp.float32)])
    w_attn_f32 = params["w_attn"].astype(jnp.float32) * col_scale[None, :]
    b_attn_f32 = params["b_attn"].astype(jnp.float32) * col_scale

    # Weights fed to the MXU in bf16 (halves weight DMA traffic); biases and
    # all elementwise math stay f32.
    w_attn = w_attn_f32.astype(jnp.bfloat16)                # (C, 3C)
    w_proj = params["w_proj"].astype(jnp.bfloat16)          # (C, C)
    b_attn = b_attn_f32.reshape(1, 3 * C)                   # (1, 3C) f32
    b_proj = params["b_proj"].reshape(1, C).astype(jnp.float32)

    kernel = functools.partial(_fused_mha_kernel,
                               num_heads=num_heads, head_size=head_size)

    # Advisory cost estimate for XLA's scheduler.
    flops = (2 * B * T * C * (3 * C)                         # qkv projection
             + B * num_heads * 4 * T * T * head_size         # scores + p@v
             + 2 * B * T * C * C)                            # output projection
    transcendentals = B * num_heads * T * (T + 1)            # exp + reciprocal
    bytes_accessed = (B * T * C * 4 * 2                      # x in, out
                      + w_attn.size * 2 + w_proj.size * 2    # bf16 weights
                      + b_attn.size * 4 + b_proj.size * 4
                      + 2 * T * head_size * 4)               # cos, sin

    spec_bt = pl.BlockSpec((None, T, C), lambda b: (b, 0, 0))
    spec_full2d = lambda shape: pl.BlockSpec(shape, lambda b: (0, 0))

    return pl.pallas_call(
        kernel,
        out_shape=jax.ShapeDtypeStruct((B, T, C), x.dtype),
        grid=(B,),
        in_specs=[
            spec_bt,                              # x
            spec_full2d((C, 3 * C)),              # w_attn (resident across steps)
            spec_full2d((1, 3 * C)),              # b_attn
            spec_full2d((C, C)),                  # w_proj
            spec_full2d((1, C)),                  # b_proj
            spec_full2d((T, head_size)),          # cos
            spec_full2d((T, head_size)),          # sin (sign-folded)
        ],
        out_specs=spec_bt,
        compiler_params=pltpu.CompilerParams(
            dimension_semantics=("parallel",)),
        cost_estimate=pl.CostEstimate(
            flops=flops, transcendentals=transcendentals,
            bytes_accessed=bytes_accessed),
    )(x, w_attn, b_attn, w_proj, b_proj, cos, sin_signed)


# ---------------------------- Pure-JAX reference -----------------------------

def reference_forward(x, params, num_heads, head_size):
    B, T, C = x.shape
    qkv = x @ params["w_attn"] + params["b_attn"]
    q, k, v = jnp.split(qkv, 3, axis=-1)

    def to_heads(t):
        return t.reshape(B, T, num_heads, head_size).transpose(0, 2, 1, 3)

    q, k, v = to_heads(q), to_heads(k), to_heads(v)

    half = head_size // 2
    inv_freq = 1.0 / (10000.0 ** (jnp.arange(half, dtype=jnp.float32) / half))
    t = jnp.arange(T, dtype=jnp.float32)
    ang = jnp.concatenate([t[:, None] * inv_freq[None, :]] * 2, axis=-1)
    cos, sin = jnp.cos(ang), jnp.sin(ang)

    def rot(u):
        rh = jnp.concatenate([-u[..., half:], u[..., :half]], axis=-1)
        return u * cos + rh * sin

    q, k = rot(q), rot(k)
    att = jnp.einsum("bhqd,bhkd->bhqk", q, k) / math.sqrt(head_size)
    mask = jnp.tril(jnp.ones((T, T), dtype=bool))
    att = jnp.where(mask, att, -jnp.inf)
    att = jax.nn.softmax(att, axis=-1)
    y = jnp.einsum("bhqk,bhkd->bhqd", att, v)
    y = y.transpose(0, 2, 1, 3).reshape(B, T, C)
    return y @ params["w_proj"] + params["b_proj"]


# ---------------------------------- Main --------------------------------------

if __name__ == "__main__":
    # config: n_embed = num_heads * head_size, dropout = 0.0, eval mode
    B, T = 2, 16
    num_heads, head_size = 2, 128
    n_embed = num_heads * head_size

    key = jax.random.PRNGKey(0)
    kx, k1, k2, k3, k4 = jax.random.split(key, 5)
    x = jax.random.normal(kx, (B, T, n_embed), dtype=jnp.float32)

    bound = 1.0 / math.sqrt(n_embed)  # nn.Linear default init range
    params = {
        "w_attn": jax.random.uniform(k1, (n_embed, 3 * n_embed), jnp.float32, -bound, bound),
        "b_attn": jax.random.uniform(k2, (3 * n_embed,), jnp.float32, -bound, bound),
        "w_proj": jax.random.uniform(k3, (n_embed, n_embed), jnp.float32, -bound, bound),
        "b_proj": jax.random.uniform(k4, (n_embed,), jnp.float32, -bound, bound),
    }

    fwd = jax.jit(lambda xx: custom_mha_forward(xx, params, num_heads, head_size))
    out = fwd(x)
    jax.block_until_ready(out)

    ref = reference_forward(x, params, num_heads, head_size)
    assert out.shape == (B, T, n_embed)
    max_err = float(jnp.max(jnp.abs(out - ref)))
    # Tolerance loosened vs the f32 reference because matmul operands are fed
    # to the MXU in bf16 (f32 accumulation); typical max-abs error is ~1e-2.
    if not bool(jnp.allclose(out, ref, atol=5e-2, rtol=5e-2)):
        raise AssertionError(f"Pallas output mismatch vs reference, max abs err={max_err}")

    print("KERNEL_OK")
</pallas_src>

<mosaic_0001>
module attributes {stable_mosaic.version = 11 : i64} {
  func.func @_fused_mha_kernel(%arg0: i32, %arg1: memref<1x16x256xf32, #tpu.memory_space<vmem>>, %arg2: memref<256x768xbf16, #tpu.memory_space<vmem>>, %arg3: memref<1x768xf32, #tpu.memory_space<vmem>>, %arg4: memref<256x256xbf16, #tpu.memory_space<vmem>>, %arg5: memref<1x256xf32, #tpu.memory_space<vmem>>, %arg6: memref<16x128xf32, #tpu.memory_space<vmem>>, %arg7: memref<16x128xf32, #tpu.memory_space<vmem>>, %arg8: memref<1x16x256xf32, #tpu.memory_space<vmem>>) attributes {dimension_semantics = [#tpu.dimension_semantics<parallel>], iteration_bounds = array<i64: 2>, scalar_prefetch = 0 : i64, scratch_operands = 0 : i64, tpu.core_type = #tpu.core_type<tc>, window_params = [{transform_indices = @transform_0, window_bounds = array<i64: 1, 16, 256>}, {pipeline_mode = #tpu.pipeline_mode<synchronous>, transform_indices = @transform_1, window_bounds = array<i64: 256, 768>}, {pipeline_mode = #tpu.pipeline_mode<synchronous>, transform_indices = @transform_2, window_bounds = array<i64: 1, 768>}, {pipeline_mode = #tpu.pipeline_mode<synchronous>, transform_indices = @transform_3, window_bounds = array<i64: 256, 256>}, {pipeline_mode = #tpu.pipeline_mode<synchronous>, transform_indices = @transform_4, window_bounds = array<i64: 1, 256>}, {pipeline_mode = #tpu.pipeline_mode<synchronous>, transform_indices = @transform_5, window_bounds = array<i64: 16, 128>}, {pipeline_mode = #tpu.pipeline_mode<synchronous>, transform_indices = @transform_6, window_bounds = array<i64: 16, 128>}, {transform_indices = @transform_7, window_bounds = array<i64: 1, 16, 256>}]} {
    %c0 = arith.constant 0 : index
    %c0_0 = arith.constant 0 : index
    %c0_1 = arith.constant 0 : index
    %0 = vector.load %arg1[%c0, %c0_0, %c0_1] : memref<1x16x256xf32, #tpu.memory_space<vmem>>, vector<1x16x256xf32>
    %1 = vector.shape_cast %0 : vector<1x16x256xf32> to vector<16x256xf32>
    %2 = arith.truncf %1 : vector<16x256xf32> to vector<16x256xbf16>
    %c0_2 = arith.constant 0 : index
    %c0_3 = arith.constant 0 : index
    %3 = vector.load %arg2[%c0_2, %c0_3] : memref<256x768xbf16, #tpu.memory_space<vmem>>, vector<256x768xbf16>
    %cst = arith.constant dense<0.000000e+00> : vector<16x768xf32>
    %4 = tpu.matmul %2, %3, %cst {dimension_numbers = #tpu.dot_dimension_numbers<[1], [0], [0], [1], [0, 0, 1, 1], [], []>} : vector<16x256xbf16>, vector<256x768xbf16>, vector<16x768xf32> -> vector<16x768xf32>
    %c0_4 = arith.constant 0 : index
    %c0_5 = arith.constant 0 : index
    %5 = vector.load %arg3[%c0_4, %c0_5] : memref<1x768xf32, #tpu.memory_space<vmem>>, vector<1x768xf32>
    %6 = vector.broadcast %5 : vector<1x768xf32> to vector<16x768xf32>
    %7 = arith.addf %4, %6 : vector<16x768xf32>
    %c0_6 = arith.constant 0 : index
    %c0_7 = arith.constant 0 : index
    %8 = vector.load %arg6[%c0_6, %c0_7] : memref<16x128xf32, #tpu.memory_space<vmem>>, vector<16x128xf32>
    %c0_8 = arith.constant 0 : index
    %c0_9 = arith.constant 0 : index
    %9 = vector.load %arg7[%c0_8, %c0_9] : memref<16x128xf32, #tpu.memory_space<vmem>>, vector<16x128xf32>
    %10 = tpu.iota {dimensions = array<i32: 0>} : vector<16x16xi32>
    %11 = tpu.iota {dimensions = array<i32: 1>} : vector<16x16xi32>
    %12 = arith.cmpi sle, %11, %10 : vector<16x16xi32>
    %13 = vector.extract_strided_slice %7 {offsets = [0, 0], sizes = [16, 128], strides = [1, 1]} : vector<16x768xf32> to vector<16x128xf32>
    %14 = vector.extract_strided_slice %7 {offsets = [0, 256], sizes = [16, 128], strides = [1, 1]} : vector<16x768xf32> to vector<16x128xf32>
    %15 = vector.extract_strided_slice %7 {offsets = [0, 512], sizes = [16, 128], strides = [1, 1]} : vector<16x768xf32> to vector<16x128xf32>
    %16 = arith.mulf %13, %8 : vector<16x128xf32>
    %c64_i32 = arith.constant 64 : i32
    %17 = tpu.dynamic_rotate %13 by %c64_i32 dim 1 : vector<16x128xf32>, i32 -> vector<16x128xf32>
    %18 = arith.mulf %17, %9 : vector<16x128xf32>
    %19 = arith.addf %16, %18 : vector<16x128xf32>
    %20 = arith.mulf %14, %8 : vector<16x128xf32>
    %c64_i32_10 = arith.constant 64 : i32
    %21 = tpu.dynamic_rotate %14 by %c64_i32_10 dim 1 : vector<16x128xf32>, i32 -> vector<16x128xf32>
    %22 = arith.mulf %21, %9 : vector<16x128xf32>
    %23 = arith.addf %20, %22 : vector<16x128xf32>
    %24 = arith.truncf %19 : vector<16x128xf32> to vector<16x128xbf16>
    %25 = arith.truncf %23 : vector<16x128xf32> to vector<16x128xbf16>
    %cst_11 = arith.constant dense<0.000000e+00> : vector<16x16xf32>
    %26 = tpu.matmul %24, %25, %cst_11 {dimension_numbers = #tpu.dot_dimension_numbers<[1], [1], [0], [0], [0, 0, 1, 0], [], []>} : vector<16x128xbf16>, vector<16x128xbf16>, vector<16x16xf32> -> vector<16x16xf32>
    %cst_12 = arith.constant -1.000000e+30 : f32
    %27 = vector.broadcast %cst_12 : f32 to vector<16x16xf32>
    %28 = arith.select %12, %26, %27 : vector<16x16xi1>, vector<16x16xf32>
    %cst_13 = arith.constant dense<0xFF800000> : vector<16xf32>
    %29 = vector.multi_reduction <maximumf>, %28, %cst_13 [1] : vector<16x16xf32> to vector<16xf32>
    %30 = vector.shape_cast %29 : vector<16xf32> to vector<16x1xf32>
    %31 = vector.broadcast %30 : vector<16x1xf32> to vector<16x16xf32>
    %32 = arith.subf %28, %31 : vector<16x16xf32>
    %33 = math.exp %32 : vector<16x16xf32>
    %cst_14 = arith.constant dense<0.000000e+00> : vector<16xf32>
    %34 = vector.multi_reduction <add>, %33, %cst_14 [1] : vector<16x16xf32> to vector<16xf32>
    %35 = vector.shape_cast %34 : vector<16xf32> to vector<16x1xf32>
    %36 = arith.truncf %33 : vector<16x16xf32> to vector<16x16xbf16>
    %37 = arith.truncf %15 : vector<16x128xf32> to vector<16x128xbf16>
    %cst_15 = arith.constant dense<0.000000e+00> : vector<16x128xf32>
    %38 = tpu.matmul %36, %37, %cst_15 {dimension_numbers = #tpu.dot_dimension_numbers<[1], [0], [0], [1], [0, 0, 1, 1], [], []>} : vector<16x16xbf16>, vector<16x128xbf16>, vector<16x128xf32> -> vector<16x128xf32>
    %39 = tpu.reciprocal %35 {approx = true} : vector<16x1xf32> -> vector<16x1xf32>
    %40 = vector.broadcast %39 : vector<16x1xf32> to vector<16x128xf32>
    %41 = arith.mulf %38, %40 : vector<16x128xf32>
    %42 = vector.extract_strided_slice %7 {offsets = [0, 128], sizes = [16, 128], strides = [1, 1]} : vector<16x768xf32> to vector<16x128xf32>
    %43 = vector.extract_strided_slice %7 {offsets = [0, 384], sizes = [16, 128], strides = [1, 1]} : vector<16x768xf32> to vector<16x128xf32>
    %44 = vector.extract_strided_slice %7 {offsets = [0, 640], sizes = [16, 128], strides = [1, 1]} : vector<16x768xf32> to vector<16x128xf32>
    %45 = arith.mulf %42, %8 : vector<16x128xf32>
    %c64_i32_16 = arith.constant 64 : i32
    %46 = tpu.dynamic_rotate %42 by %c64_i32_16 dim 1 : vector<16x128xf32>, i32 -> vector<16x128xf32>
    %47 = arith.mulf %46, %9 : vector<16x128xf32>
    %48 = arith.addf %45, %47 : vector<16x128xf32>
    %49 = arith.mulf %43, %8 : vector<16x128xf32>
    %c64_i32_17 = arith.constant 64 : i32
    %50 = tpu.dynamic_rotate %43 by %c64_i32_17 dim 1 : vector<16x128xf32>, i32 -> vector<16x128xf32>
    %51 = arith.mulf %50, %9 : vector<16x128xf32>
    %52 = arith.addf %49, %51 : vector<16x128xf32>
    %53 = arith.truncf %48 : vector<16x128xf32> to vector<16x128xbf16>
    %54 = arith.truncf %52 : vector<16x128xf32> to vector<16x128xbf16>
    %cst_18 = arith.constant dense<0.000000e+00> : vector<16x16xf32>
    %55 = tpu.matmul %53, %54, %cst_18 {dimension_numbers = #tpu.dot_dimension_numbers<[1], [1], [0], [0], [0, 0, 1, 0], [], []>} : vector<16x128xbf16>, vector<16x128xbf16>, vector<16x16xf32> -> vector<16x16xf32>
    %cst_19 = arith.constant -1.000000e+30 : f32
    %56 = vector.broadcast %cst_19 : f32 to vector<16x16xf32>
    %57 = arith.select %12, %55, %56 : vector<16x16xi1>, vector<16x16xf32>
    %cst_20 = arith.constant dense<0xFF800000> : vector<16xf32>
    %58 = vector.multi_reduction <maximumf>, %57, %cst_20 [1] : vector<16x16xf32> to vector<16xf32>
    %59 = vector.shape_cast %58 : vector<16xf32> to vector<16x1xf32>
    %60 = vector.broadcast %59 : vector<16x1xf32> to vector<16x16xf32>
    %61 = arith.subf %57, %60 : vector<16x16xf32>
    %62 = math.exp %61 : vector<16x16xf32>
    %cst_21 = arith.constant dense<0.000000e+00> : vector<16xf32>
    %63 = vector.multi_reduction <add>, %62, %cst_21 [1] : vector<16x16xf32> to vector<16xf32>
    %64 = vector.shape_cast %63 : vector<16xf32> to vector<16x1xf32>
    %65 = arith.truncf %62 : vector<16x16xf32> to vector<16x16xbf16>
    %66 = arith.truncf %44 : vector<16x128xf32> to vector<16x128xbf16>
    %cst_22 = arith.constant dense<0.000000e+00> : vector<16x128xf32>
    %67 = tpu.matmul %65, %66, %cst_22 {dimension_numbers = #tpu.dot_dimension_numbers<[1], [0], [0], [1], [0, 0, 1, 1], [], []>} : vector<16x16xbf16>, vector<16x128xbf16>, vector<16x128xf32> -> vector<16x128xf32>
    %68 = tpu.reciprocal %64 {approx = true} : vector<16x1xf32> -> vector<16x1xf32>
    %69 = vector.broadcast %68 : vector<16x1xf32> to vector<16x128xf32>
    %70 = arith.mulf %67, %69 : vector<16x128xf32>
    %71 = tpu.concatenate %41, %70 in 1 : vector<16x128xf32>, vector<16x128xf32> -> vector<16x256xf32>
    %72 = arith.truncf %71 : vector<16x256xf32> to vector<16x256xbf16>
    %c0_23 = arith.constant 0 : index
    %c0_24 = arith.constant 0 : index
    %73 = vector.load %arg4[%c0_23, %c0_24] : memref<256x256xbf16, #tpu.memory_space<vmem>>, vector<256x256xbf16>
    %cst_25 = arith.constant dense<0.000000e+00> : vector<16x256xf32>
    %74 = tpu.matmul %72, %73, %cst_25 {dimension_numbers = #tpu.dot_dimension_numbers<[1], [0], [0], [1], [0, 0, 1, 1], [], []>} : vector<16x256xbf16>, vector<256x256xbf16>, vector<16x256xf32> -> vector<16x256xf32>
    %c0_26 = arith.constant 0 : index
    %c0_27 = arith.constant 0 : index
    %75 = vector.load %arg5[%c0_26, %c0_27] : memref<1x256xf32, #tpu.memory_space<vmem>>, vector<1x256xf32>
    %76 = vector.broadcast %75 : vector<1x256xf32> to vector<16x256xf32>
    %77 = arith.addf %74, %76 : vector<16x256xf32>
    %c0_28 = arith.constant 0 : index
    %c0_29 = arith.constant 0 : index
    %c0_30 = arith.constant 0 : index
    %78 = vector.load %arg8[%c0_28, %c0_29, %c0_30] : memref<1x16x256xf32, #tpu.memory_space<vmem>>, vector<1x16x256xf32>
    %79 = vector.shape_cast %78 : vector<1x16x256xf32> to vector<16x256xf32>
    %80 = vector.shape_cast %77 : vector<16x256xf32> to vector<1x16x256xf32>
    tpu.vector_store %arg8[%c0_28, %c0_29, %c0_30], %80 {strides = array<i32>} : memref<1x16x256xf32, #tpu.memory_space<vmem>>, vector<1x16x256xf32>,
    return
  }
  func.func @transform_0(%arg0: i32) -> (i32, i32, i32) {
    %c0_i32 = arith.constant 0 : i32
    %c0_i32_0 = arith.constant 0 : i32
    %c0_i32_1 = arith.constant 0 : i32
    return %arg0, %c0_i32, %c0_i32_0 : i32, i32, i32
  }
  func.func @transform_1(%arg0: i32) -> (i32, i32) {
    %c0_i32 = arith.constant 0 : i32
    %c0_i32_0 = arith.constant 0 : i32
    %c0_i32_1 = arith.constant 0 : i32
    return %c0_i32, %c0_i32_0 : i32, i32
  }
  func.func @transform_2(%arg0: i32) -> (i32, i32) {
    %c0_i32 = arith.constant 0 : i32
    %c0_i32_0 = arith.constant 0 : i32
    %c0_i32_1 = arith.constant 0 : i32
    return %c0_i32, %c0_i32_0 : i32, i32
  }
  func.func @transform_3(%arg0: i32) -> (i32, i32) {
    %c0_i32 = arith.constant 0 : i32
    %c0_i32_0 = arith.constant 0 : i32
    %c0_i32_1 = arith.constant 0 : i32
    return %c0_i32, %c0_i32_0 : i32, i32
  }
  func.func @transform_4(%arg0: i32) -> (i32, i32) {
    %c0_i32 = arith.constant 0 : i32
    %c0_i32_0 = arith.constant 0 : i32
    %c0_i32_1 = arith.constant 0 : i32
    return %c0_i32, %c0_i32_0 : i32, i32
  }
  func.func @transform_5(%arg0: i32) -> (i32, i32) {
    %c0_i32 = arith.constant 0 : i32
    %c0_i32_0 = arith.constant 0 : i32
    %c0_i32_1 = arith.constant 0 : i32
    return %c0_i32, %c0_i32_0 : i32, i32
  }
  func.func @transform_6(%arg0: i32) -> (i32, i32) {
    %c0_i32 = arith.constant 0 : i32
    %c0_i32_0 = arith.constant 0 : i32
    %c0_i32_1 = arith.constant 0 : i32
    return %c0_i32, %c0_i32_0 : i32, i32
  }
  func.func @transform_7(%arg0: i32) -> (i32, i32, i32) {
    %c0_i32 = arith.constant 0 : i32
    %c0_i32_0 = arith.constant 0 : i32
    %c0_i32_1 = arith.constant 0 : i32
    return %arg0, %c0_i32, %c0_i32_0 : i32, i32, i32
  }
}

</mosaic_0001>

<bundles_post_ra>
// kernel: _lambda_.1
= control target key start
LH: loop header
LB: loop body
LE: loop exit
PB: predicated region body
PF: predicated region fallthrough
CT: control target
= control target key end

     0   :  { %12 = vsyncpa [#allocation3], 0  ;;  %s2533_s0 = inlined_call_operand.vmem [shape: f32[2,16,256], index: 0, kind: input, shape index: {}]   ;;  %s2534_s1 = inlined_call_operand.hbm [shape: bf16[256,768], index: 1, kind: input, shape index: {}]   ;;  %s2535_s2 = inlined_call_operand.vmem [shape: f32[1,768], index: 2, kind: input, shape index: {}]   ;;  %s2536_s3 = inlined_call_operand.hbm [shape: bf16[256,256], index: 3, kind: input, shape index: {}]   ;;  %s2537_s4 = inlined_call_operand.vmem [shape: f32[1,256], index: 4, kind: input, shape index: {}]   ;;  %s2538_s5 = inlined_call_operand.vmem [shape: f32[16,128], index: 5, kind: input, shape index: {}]   ;;  %s2539_s6 = inlined_call_operand.vmem [shape: f32[16,128], index: 6, kind: input, shape index: {}]   ;;  %s2540_s7 = inlined_call_operand.hbm [shape: f32[2,16,256], index: 7, kind: output, shape index: {}]  }
   0x1   :  { %13 = vsyncpa [#allocation6], 0 }
   0x2   :  { %14 = vsyncpa [#allocation4], 0 }
   0x3   :  { %16 = vsyncpa [#allocation4 + $0x1], 0  ;;  %s2311_s24 = smov 0   ;;  %s2313_s25 = smov 0  }
   0x4   :  { %s2315_s26 = smov 0   ;;  %s2317_s27 = smov 0  }
   0x5 LB: > { %s2332_s28 = sadd.s32 4294967295, %s2257_s27   ;;  %s1680_s29 = sadd.s32 4294967294, %s2257_s27   ;;  %s2257_s27 = sphi %s2317_s27, %s2554_s27   ;;  %s2253_s26 = sphi %s2315_s26, %s2553_s26   ;;  %s2249_s25 = sphi %s2313_s25, %s2552_s25   ;;  %s2245_s24 = sphi %s2311_s24, %s2551_s24  }
   0x6   : > { %s2336_s30 = sadd.s32 1, %s2257_s27   ;;  %s181_s8 = sadd.s32 1, %s2253_s26 }
   0x7   : > { %s178_s9 = ssub.s32 %s2257_s27, %s2336_s30  ;;  %p191_p0 = scmp.ne.s32.totalorder %s2253_s26, %s2249_s25 }
   0x8   : > { %p179_p1 = scmp.eq.s32.totalorder %s178_s9, 0  ;;  %p192_p2 = scmp.eq.s32.totalorder %s2332_s28, 1 }
   0x9   : > { %p197_p3 = scmp.ne.s32.totalorder %s2249_s25, %s2245_s24  ;;  %p198_p4 = scmp.eq.s32.totalorder %s1680_s29, 1 }
   0xa   : > { %s2347_s10 = scalar_select %p179_p1, %s2253_s26, %s181_s8  }
   0xb   : > { %p2349_p5 = por %p192_p2, %p191_p0  ;;  %p2353_p6 = por %p198_p4, %p197_p3 }
   0xc   : > { %p1681_p7 = scmp.ge.s32.totalorder %s2257_s27, 1  ;;  %p205_p8 = scmp.lt.s32.totalorder %s2257_s27, 3 }
   0xd   : > { %s2543_s12 = scalar_select %p2353_p6, 1, 0 }
   0xe   : > { %p2541_p9 = scmp.eq.s32.totalorder %s2332_s28, 0  ;;  %p2360_p10 = pnand %p1681_p7, %p205_p8 }
   0xf   : > { %s2259_s14 = smov [#allocation2]   ;;  %s2260_s17 = smov [#allocation5]  }
  0x10   : > { %s217_s15 = sshll.u32 %s2259_s14, 4  ;;  %p1870_p11 = pneg %p2360_p10  ;;  %s218_s15 = int_to_ptr.vmem [resolvable:$true] %s217_s15 }
  0x11   : > { %s233_s18 = sshll.u32 %s2260_s17, 4  ;;  %s2148_s19 = scalar_lea.vmem %s218_s15, 12288  ;;  %s234_s18 = int_to_ptr.vmem [resolvable:$true] %s233_s18 }
  0x12   : > { %p2368_p12 = pnand %p2541_p9, %p1870_p11  ;;  %p2149_p0 = scmp.ne.s32.totalorder %s218_s15, %s2148_s19 }
  0x13   : > { %p2156_p3 = scmp.lt.s32.totalorder %s218_s15, %s218_s15  ;;  %p2157_p4 = scmp.lt.s32.totalorder %s2148_s19, %s2148_s19 }
  0x14   : > { %p2139_p13 = pneg %p2368_p12 }
  0x15   : > { %p2158_p7 = por %p2157_p4, %p2156_p3 }
  0x16   : > { %p2151_p1 = pnand %p2149_p0, %p2139_p13 }
  0x18   : > { %p2152_p2 = pneg %p2151_p1 }
  0x1a   : > { %p2159_p8 = pnand %p2158_p7, %p2152_p2 }
  0x1c   : > { %2162 = shalt.err (!%p2159_p8)
}
  0x1d   : > { %s2261_s20 = smov 384   ;;  %s2262_s21 = smov 24  }
  0x1e   : > { %1873 = dma.hbm_to_vmem [thread:$0]  (!%p2368_p12), %s2534_s1, 12288, %s218_s15, [#allocation3], %s2261_s20, %s2261_s20, %s2262_s21  }
  0x1f   : > { %s2174_s29 = scalar_lea.vmem %s234_s18, 4096  ;;  %p2182_p9 = scmp.lt.s32.totalorder %s234_s18, %s234_s18 }
  0x20   : > { %p2175_p11 = scmp.ne.s32.totalorder %s234_s18, %s2174_s29  ;;  %p2183_p6 = scmp.lt.s32.totalorder %s2174_s29, %s2174_s29 }
  0x22   : > { %p2177_p0 = pnand %p2175_p11, %p2139_p13  ;;  %p2184_p3 = por %p2183_p6, %p2182_p9 }
  0x24   : > { %p2178_p1 = pneg %p2177_p0 }
  0x26   : > { %p2185_p2 = pnand %p2184_p3, %p2178_p1 }
  0x28   : > { %2188 = shalt.err (!%p2185_p2)
}
  0x29   : > { %s2263_s8 = smov 128   ;;  %s2264_s9 = smov 8  }
  0x2a   : > { %1876 = dma.hbm_to_vmem [thread:$0]  (!%p2368_p12), %s2536_s3, 4096, %s234_s18, [#allocation6], %s2263_s8, %s2263_s8, %s2264_s9  }
  0x2b   : > { %266 = sbr.rel (%p2360_p10) target bundleno = 1223 (0x4c7), region = 48  ;;  %p2546_p4 = scmp.eq.s32.totalorder (!%p2360_p10), %s2332_s28, 0 }
  0x30   : > { %2232 = dma.done.wait (%p2546_p4), [#allocation3], 12288   ;;  %p2547_p13 = pmov %p2546_p4 }
  0x31   : > { %p2548_p6 = pmov %p2546_p4 }
  0x32   : > { %2234 = vsyncadd (%p2547_p13), [#allocation3], 4294955008 }
  0x33   : > { %2236 = dma.done.wait (%p2548_p6), [#allocation6], 4096   ;;  %p2549_p9 = pmov %p2546_p4 }
  0x34   : > { %v1929_v0 = vld [vmem:[#allocation2 + $0x15c] ss:$24 sps:$4 sm:$0xff]   ;;  %v1931_v1 = vld [vmem:[#allocation2 + $0x158] ss:$24 sps:$4 sm:$0xff]   ;;  %v1935_v4 = vld [vmem:[#allocation2 + $0x12c] ss:$24 sps:$4 sm:$0xff]  }
  0x35   : > { %2238 = vsyncadd (%p2549_p9), [#allocation6], 4294963200  ;;  %965 = vmatprep.subr.bf16.mxu1 %v1929_v0  ;;  %v1932_v2 = vld [vmem:[#allocation2 + $0x154] ss:$24 sps:$4 sm:$0xff]   ;;  %v1934_v3 = vld [vmem:[#allocation2 + $0x150] ss:$24 sps:$4 sm:$0xff]  }
  0x36   : > { %966 = vmatpush1.bf16.msra.mxu1 %v1931_v1  ;;  %v1937_v5 = vld [vmem:[#allocation2 + $0x128] ss:$24 sps:$4 sm:$0xff]   ;;  %922 = vmatprep.subr.bf16.mxu0 %v1932_v2  ;;  %v1938_v6 = vld [vmem:[#allocation2 + $0x124] ss:$24 sps:$4 sm:$0xff]   ;;  %v1943_v9 = vld [vmem:[#allocation2 + $0xf8] ss:$24 sps:$4 sm:$0xff]  }
  0x37   : > { %923 = vmatpush1.bf16.msra.mxu0 %v1934_v3  ;;  %967 = vmatprep.subr.bf16.mxu1 %v1935_v4  ;;  %v1940_v7 = vld [vmem:[#allocation2 + $0x120] ss:$24 sps:$4 sm:$0xff]   ;;  %v1941_v8 = vld [vmem:[#allocation2 + $0xfc] ss:$24 sps:$4 sm:$0xff]   ;;  %v1947_v11 = vld [vmem:[#allocation2 + $0xcc] ss:$24 sps:$4 sm:$0xff]  }
  0x38   : > { %924 = vmatprep.subr.bf16.mxu0 %v1938_v6  ;;  %v1944_v10 = vld [vmem:[#allocation2 + $0xf4] ss:$24 sps:$4 sm:$0xff]   ;;  %v1946_v12 = vld [vmem:[#allocation2 + $0xf0] ss:$24 sps:$4 sm:$0xff]   ;;  %v1950_v13 = vld [vmem:[#allocation2 + $0xc4] ss:$24 sps:$4 sm:$0xff]  }
  0x39   : > { %v1949_v14 = vld [vmem:[#allocation2 + $0xc8] ss:$24 sps:$4 sm:$0xff]   ;;  %v1953_v15 = vld [vmem:[#allocation2 + $0x9c] ss:$24 sps:$4 sm:$0xff]   ;;  %v1955_v18 = vld [vmem:[#allocation2 + $0x98] ss:$24 sps:$4 sm:$0xff]  }
  0x3a   : > { %968 = vmatpush1.bf16.msra.mxu1 %v1937_v5  ;;  %v1952_v16 = vld [vmem:[#allocation2 + $0xc0] ss:$24 sps:$4 sm:$0xff]   ;;  %v1956_v17 = vld [vmem:[#allocation2 + $0x94] ss:$24 sps:$4 sm:$0xff]   ;;  %v1958_v20 = vld [vmem:[#allocation2 + $0x90] ss:$24 sps:$4 sm:$0xff]  }
  0x3b   : > { %969 = vmatprep.subr.bf16.mxu1 %v1941_v8  ;;  %925 = vmatpush1.bf16.msra.mxu0 %v1940_v7  ;;  %v1959_v19 = vld [vmem:[#allocation2 + $0x6c] ss:$24 sps:$4 sm:$0xff]   ;;  %v1961_v22 = vld [vmem:[#allocation2 + $0x68] ss:$24 sps:$4 sm:$0xff]   ;;  %v1965_v23 = vld [vmem:[#allocation2 + $0x3c] ss:$24 sps:$4 sm:$0xff]  }
  0x3c   : > { %926 = vmatprep.subr.bf16.mxu0 %v1944_v10  ;;  %v1962_v21 = vld [vmem:[#allocation2 + $0x64] ss:$24 sps:$4 sm:$0xff]   ;;  %v1964_v24 = vld [vmem:[#allocation2 + $0x60] ss:$24 sps:$4 sm:$0xff]   ;;  %v1968_v25 = vld [vmem:[#allocation2 + $0x34] ss:$24 sps:$4 sm:$0xff]  }
  0x3d   : > { %v1967_v26 = vld [vmem:[#allocation2 + $0x38] ss:$24 sps:$4 sm:$0xff]   ;;  %v1971_v27 = vld [vmem:[#allocation2 + $0xc] ss:$24 sps:$4 sm:$0xff]   ;;  %v1973_v30 = vld [vmem:[#allocation2 + $0x8] ss:$24 sps:$4 sm:$0xff]  }
  0x3e   : > { %970 = vmatpush1.bf16.msra.mxu1 %v1943_v9  ;;  %v1970_v28 = vld [vmem:[#allocation2 + $0x30] ss:$24 sps:$4 sm:$0xff]   ;;  %v1974_v29 = vld [vmem:[#allocation2 + $0x4] ss:$24 sps:$4 sm:$0xff]   ;;  %p302_p10 = scmp.lt.s32.totalorder %s2332_s28, 1  ;;  %s2266_s22 = smov 64  }
  0x3f   : > { %971 = vmatprep.subr.bf16.mxu1 %v1947_v11  ;;  %927 = vmatpush1.bf16.msra.mxu0 %v1946_v12  ;;  %v1977_v31 = vld [vmem:[#allocation2 + $0x2dc] ss:$24 sps:$4 sm:$0xff]   ;;  %v1976_v32 = vld [vmem:[#allocation2] ss:$24 sps:$4 sm:$0xff]   ;;  %v1983_v35 = vld [vmem:[#allocation2 + $0x2ac] ss:$24 sps:$4 sm:$0xff]  }
  0x40   : > { %928 = vmatprep.subr.bf16.mxu0 %v1950_v13  ;;  %v1980_v33 = vld [vmem:[#allocation2 + $0x2d4] ss:$24 sps:$4 sm:$0xff]   ;;  %v1979_v34 = vld [vmem:[#allocation2 + $0x2d8] ss:$24 sps:$4 sm:$0xff]   ;;  %s303_s13 = scalar_select %p302_p10, %s2332_s28, 1  ;;  %vm2267_vm0 = vmmov 0  }
  0x41   : > { %v1982_v36 = vld [vmem:[#allocation2 + $0x2d0] ss:$24 sps:$4 sm:$0xff]   ;;  %v1986_v37 = vld [vmem:[#allocation2 + $0x2a4] ss:$24 sps:$4 sm:$0xff]   ;;  %v1988_v40 = vld [vmem:[#allocation2 + $0x2a0] ss:$24 sps:$4 sm:$0xff]  }
  0x42   : > { %972 = vmatpush1.bf16.msra.mxu1 %v1949_v14  ;;  %v1985_v38 = vld [vmem:[#allocation2 + $0x2a8] ss:$24 sps:$4 sm:$0xff]   ;;  %v1989_v39 = vld [vmem:[#allocation2 + $0x27c] ss:$24 sps:$4 sm:$0xff]   ;;  %s1826_s15 = sshll.u32 %s303_s13, 5  ;;  %vm1127_vm2 = vcmask 130048  }
  0x43   : > { %973 = vmatprep.subr.bf16.mxu1 %v1953_v15  ;;  %929 = vmatpush1.bf16.msra.mxu0 %v1952_v16  ;;  %v1992_v41 = vld [vmem:[#allocation2 + $0x274] ss:$24 sps:$4 sm:$0xff]   ;;  %v1991_v42 = vld [vmem:[#allocation2 + $0x278] ss:$24 sps:$4 sm:$0xff]   ;;  %s2405_s19 = scalar_lea.vmem %s2533_s0, %s1826_s15  ;;  %v1997_v45 = vld [vmem:[#allocation2 + $0x248] ss:$24 sps:$4 sm:$0xff]  }
  0x44   : > { %930 = vmatprep.subr.bf16.mxu0 %v1956_v17  ;;  %v1995_v43 = vld [vmem:[#allocation2 + $0x24c] ss:$24 sps:$4 sm:$0xff]   ;;  %v1994_v44 = vld [vmem:[#allocation2 + $0x270] ss:$24 sps:$4 sm:$0xff]   ;;  %v2000_v48 = vld [vmem:[#allocation2 + $0x240] ss:$24 sps:$4 sm:$0xff]  }
  0x45   : > { %v1998_v46 = vld [vmem:[#allocation2 + $0x244] ss:$24 sps:$4 sm:$0xff]   ;;  %v309_v47 = vld [vmem:[%s2405_s19 + $0x8] sm:$0xff]  ;;  %v2003_v53 = vld [vmem:[#allocation2 + $0x218] ss:$24 sps:$4 sm:$0xff]   ;;  %s299_s16 = sand.u32 1, %s2249_s25  }
  0x46   : > { %974 = vmatpush1.bf16.msra.mxu1 %v1955_v18  ;;  %v2001_v49 = vld [vmem:[#allocation2 + $0x21c] ss:$24 sps:$4 sm:$0xff]   ;;  %v2007_v54 = vld [vmem:[#allocation2 + $0x1ec] ss:$24 sps:$4 sm:$0xff]   ;;  %v2006_v55 = vld [vmem:[#allocation2 + $0x210] ss:$24 sps:$4 sm:$0xff]  }
  0x47   : > { %975 = vmatprep.subr.bf16.mxu1 %v1959_v19  ;;  %931 = vmatpush1.bf16.msra.mxu0 %v1958_v20  ;;  %v311_v50 = vld [vmem:[%s2405_s19 + $0x18] sm:$0xff]  ;;  %v2004_v51 = vld [vmem:[#allocation2 + $0x214] ss:$24 sps:$4 sm:$0xff]   ;;  %v2009_v57 = vld [vmem:[#allocation2 + $0x1e8] ss:$24 sps:$4 sm:$0xff]   ;;  %s1688_s20 = sshll.u32 %s299_s16, 5 }
  0x48   : > { %932 = vmatprep.subr.bf16.mxu0 %v1962_v21  ;;  %v313_v52 = vpack.c.bf16 %v311_v50, %v309_v47  ;;  %v2010_v56 = vld [vmem:[#allocation2 + $0x1e4] ss:$24 sps:$4 sm:$0xff]   ;;  %v2012_v59 = vld [vmem:[#allocation2 + $0x1e0] ss:$24 sps:$4 sm:$0xff]   ;;  %v2016_v60 = vld [vmem:[#allocation2 + $0x1b4] ss:$24 sps:$4 sm:$0xff]  }
  0x49   : > { %v2013_v58 = vld [vmem:[#allocation2 + $0x1bc] ss:$24 sps:$4 sm:$0xff]   ;;  %v2015_v61 = vld [vmem:[#allocation2 + $0x1b8] ss:$24 sps:$4 sm:$0xff]   ;;  %v2019_v62 = vld [vmem:[#allocation2 + $0x18c] ss:$24 sps:$4 sm:$0xff]  }
  0x4a   : > { %976 = vmatpush1.bf16.msra.mxu1 %v1961_v22  ;;  %997 = vmatprep.mubr.bf16.mxu1 %v313_v52  ;;  %v2018_v63 = vld [vmem:[#allocation2 + $0x1b0] ss:$24 sps:$4 sm:$0xff]   ;;  %v2022_v0 = vld [vmem:[#allocation2 + $0x184] ss:$24 sps:$4 sm:$0xff]   ;;  %v2024_v4 = vld [vmem:[#allocation2 + $0x180] ss:$24 sps:$4 sm:$0xff]  }
  0x4b   : > { %977 = vmatprep.subr.bf16.mxu1 %v1965_v23  ;;  %933 = vmatpush1.bf16.msra.mxu0 %v1964_v24  ;;  %v2021_v1 = vld [vmem:[#allocation2 + $0x188] ss:$24 sps:$4 sm:$0xff]   ;;  %v310_v3 = vld [vmem:[%s2405_s19 + $0x10] sm:$0xff]  ;;  %v2027_v7 = vld [vmem:[#allocation2 + $0x164] ss:$24 sps:$4 sm:$0xff]   ;;  %s301_s21 = scalar_lea.vmem [#allocation7], %s1688_s20 }
  0x4c   : > { %934 = vmatprep.subr.bf16.mxu0 %v1968_v25  ;;  %954 = vmatprep.mubr.bf16.mxu0 %v313_v52  ;;  %v308_v2 = vld [vmem:[%s2405_s19] sm:$0xff]  ;;  %v2030_v8 = vld [vmem:[#allocation2 + $0x134] ss:$24 sps:$4 sm:$0xff]   ;;  %v2028_v9 = vld [vmem:[#allocation2 + $0x130] ss:$24 sps:$4 sm:$0xff]   ;;  %s1827_s23 = sshll.u32 %s2332_s28, 9 }
  0x4d   : > { %v2411_v5 = vpack.c.bf16 %v310_v3, %v308_v2  ;;  %v2025_v6 = vld [vmem:[#allocation2 + $0x160] ss:$24 sps:$4 sm:$0xff]   ;;  %v2033_v10 = vld [vmem:[#allocation2 + $0x104] ss:$24 sps:$4 sm:$0xff]   ;;  %v2036_v12 = vld [vmem:[#allocation2 + $0xd4] ss:$24 sps:$4 sm:$0xff]   ;;  %s2491_s9 = scalar_lea.hbm %s2540_s7, %s1827_s23 }
  0x4e   : > { %978 = vmatpush1.bf16.msra.mxu1 %v1967_v26  ;;  %v2031_v11 = vld [vmem:[#allocation2 + $0x100] ss:$24 sps:$4 sm:$0xff]   ;;  %v2034_v13 = vld [vmem:[#allocation2 + $0xd0] ss:$24 sps:$4 sm:$0xff]   ;;  %v2039_v14 = vld [vmem:[#allocation2 + $0xa4] ss:$24 sps:$4 sm:$0xff]  }
  0x4f   : > { %979 = vmatprep.subr.bf16.mxu1 %v1971_v27  ;;  %935 = vmatpush1.bf16.msra.mxu0 %v1970_v28  ;;  %v2037_v15 = vld [vmem:[#allocation2 + $0xa0] ss:$24 sps:$4 sm:$0xff]   ;;  %v2042_v16 = vld [vmem:[#allocation2 + $0x74] ss:$24 sps:$4 sm:$0xff]   ;;  %v2040_v17 = vld [vmem:[#allocation2 + $0x70] ss:$24 sps:$4 sm:$0xff]  }
  0x50   : > { %936 = vmatprep.subr.bf16.mxu0 %v1974_v29  ;;  %v2045_v18 = vld [vmem:[#allocation2 + $0x44] ss:$24 sps:$4 sm:$0xff]   ;;  %v2043_v19 = vld [vmem:[#allocation2 + $0x40] ss:$24 sps:$4 sm:$0xff]   ;;  %v2048_v20 = vld [vmem:[#allocation2 + $0x14] ss:$24 sps:$4 sm:$0xff]  }
  0x51   : > { %v2046_v21 = vld [vmem:[#allocation2 + $0x10] ss:$24 sps:$4 sm:$0xff]   ;;  %v2051_v22 = vld [vmem:[#allocation2 + $0x2e4] ss:$24 sps:$4 sm:$0xff]   ;;  %v2049_v23 = vld [vmem:[#allocation2 + $0x2e0] ss:$24 sps:$4 sm:$0xff]  }
  0x52   : > { %980 = vmatpush1.bf16.msra.mxu1 %v1973_v30  ;;  %v2054_v24 = vld [vmem:[#allocation2 + $0x2b4] ss:$24 sps:$4 sm:$0xff]   ;;  %v2052_v25 = vld [vmem:[#allocation2 + $0x2b0] ss:$24 sps:$4 sm:$0xff]   ;;  %v2057_v26 = vld [vmem:[#allocation2 + $0x284] ss:$24 sps:$4 sm:$0xff]  }
  0x53   : > { %981 = vmatprep.subr.bf16.mxu1 %v1977_v31  ;;  %937 = vmatpush1.bf16.msra.mxu0 %v1976_v32  ;;  %v2055_v27 = vld [vmem:[#allocation2 + $0x280] ss:$24 sps:$4 sm:$0xff]   ;;  %v2060_v28 = vld [vmem:[#allocation2 + $0x254] ss:$24 sps:$4 sm:$0xff]   ;;  %v2058_v29 = vld [vmem:[#allocation2 + $0x250] ss:$24 sps:$4 sm:$0xff]  }
  0x54   : > { %938 = vmatprep.subr.bf16.mxu0 %v1980_v33  ;;  %v2063_v30 = vld [vmem:[#allocation2 + $0x224] ss:$24 sps:$4 sm:$0xff]   ;;  %v2061_v31 = vld [vmem:[#allocation2 + $0x220] ss:$24 sps:$4 sm:$0xff]   ;;  %v2066_v32 = vld [vmem:[#allocation2 + $0x1f4] ss:$24 sps:$4 sm:$0xff]  }
  0x55   : > { %v2064_v33 = vld [vmem:[#allocation2 + $0x1f0] ss:$24 sps:$4 sm:$0xff]   ;;  %v1053_v2 = vld [vmem:[%s2539_s6] sm:$0xff]  ;;  %s2493_s14 = scalar_lea.sflag [#allocation4], %s299_s16  ;;  %s2268_s28 = smov [#allocation7]  }
  0x56   : > { %982 = vmatpush2.bf16.msra.mxu1 %v1979_v34  ;;  %v412_v34 = vlaneseq  ;;  %s2193_s13 = sshll.u32 %s2268_s28, 4  ;;  %s2194_s13 = int_to_ptr.vmem [resolvable:$false] %s2193_s13 }
  0x57   : > { %983 = vmatprep.subr.bf16.mxu1 %v1983_v35  ;;  %939 = vmatpush2.bf16.msra.mxu0 %v1982_v36  ;;  %v2069_v36 = vld [vmem:[#allocation2 + $0x1c4] ss:$24 sps:$4 sm:$0xff]   ;;  %s2195_s15 = scalar_lea.vmem %s2194_s13, 1024 }
  0x58   : > { %940 = vmatprep.subr.bf16.mxu0 %v1986_v37  ;;  %v2416_v35 = vshrl.u32 %v412_v34, 7  ;;  %v2067_v37 = vld [vmem:[#allocation2 + $0x1c0] ss:$24 sps:$4 sm:$0xff]  }
  0x5a   : > { %984 = vmatpush2.bf16.msra.mxu1 %v1985_v38  ;;  %v422_v38 = vsub.s32 2, %v2416_v35 }
  0x5b   : > { %985 = vmatprep.subr.bf16.mxu1 %v1989_v39  ;;  %941 = vmatpush2.bf16.msra.mxu0 %v1988_v40  ;;  %v2422_v39 = vld [vmem:[%s2535_s2] sm:$0x3f]  ;;  %v2072_v40 = vld [vmem:[#allocation2 + $0x194] ss:$24 sps:$4 sm:$0xff]  }
  0x5c   : > { %942 = vmatprep.subr.bf16.mxu0 %v1992_v41  ;;  %v426_v41 = vsub.s32 3, %v2416_v35 }
  0x5e   : > { %986 = vmatpush2.bf16.msra.mxu1 %v1991_v42  ;;  %v2070_v42 = vld [vmem:[#allocation2 + $0x190] ss:$24 sps:$4 sm:$0xff]  }
  0x5f   : > { %987 = vmatprep.subr.bf16.mxu1 %v1995_v43  ;;  %943 = vmatpush2.bf16.msra.mxu0 %v1994_v44  ;;  %v423_v43 = vrot.slane %v2422_v39, %v422_v38  ;;  %v427_v44 = vrot.slane %v2422_v39, %v426_v41 }
  0x60   : > { %944 = vmatprep.subr.bf16.mxu0 %v1998_v46  ;;  %v2265_v46 = vmov 0.0  }
  0x62   : > { %988 = vmatpush2.bf16.msra.mxu1 %v1997_v45 }
  0x63   : > { %989 = vmatprep.subr.bf16.mxu1 %v2001_v49  ;;  %945 = vmatpush2.bf16.msra.mxu0 %v2000_v48  ;;  %v418_v48 = vsub.s32 1, %v2416_v35 }
  0x64   : > { %946 = vmatprep.subr.bf16.mxu0 %v2004_v51 }
  0x66   : > { %990 = vmatpush2.bf16.msra.mxu1 %v2003_v53 }
  0x67   : > { %991 = vmatprep.subr.bf16.mxu1 %v2007_v54  ;;  %947 = vmatpush2.bf16.msra.mxu0 %v2006_v55  ;;  %v414_v54 = vsub.s32 0, %v2416_v35  ;;  %v419_v55 = vrot.slane %v2422_v39, %v418_v48 }
  0x68   : > { %948 = vmatprep.subr.bf16.mxu0 %v2010_v56 }
  0x6a   : > { %992 = vmatpush2.bf16.msra.mxu1 %v2009_v57 }
  0x6b   : > { %993 = vmatprep.subr.bf16.mxu1 %v2013_v58  ;;  %949 = vmatpush2.bf16.msra.mxu0 %v2012_v59 }
  0x6c   : > { %950 = vmatprep.subr.bf16.mxu0 %v2016_v60 }
  0x6e   : > { %994 = vmatpush2.bf16.msra.mxu1 %v2015_v61  ;;  %v415_v61 = vrot.slane %v2422_v39, %v414_v54 }
  0x6f   : > { %995 = vmatprep.subr.bf16.mxu1 %v2019_v62  ;;  %951 = vmatpush2.bf16.msra.mxu0 %v2018_v63 }
  0x70   : > { %952 = vmatprep.subr.bf16.mxu0 %v2022_v0 }
  0x72   : > { %996 = vmatpush2.bf16.msra.mxu1 %v2021_v1 }
  0x73   : > { %953 = vmatpush2.bf16.msra.mxu0 %v2024_v4  ;;  %1848 = vmatprep.subr.bf16.mxu1 %v2265_v46  ;;  %v1051_v4 = vld [vmem:[%s2538_s5] sm:$0xff] }
  0x74   : > { %1008 = vmatprep.subr.bf16.mxu0 %v2027_v7  ;;  %v1054_v7 = vld [vmem:[%s2539_s6 + $0x8] sm:$0xff] }
  0x75   : > { %998 = vmatmul.mubr.bf16.vlgmr.msra.gmra.mxu1 %v2411_v5 }
  0x76   : > { %955 = vmatmul.mubr.bf16.vlgmr.msra.gmra.mxu0 %v2411_v5  ;;  %1850 = vmatprep.mubr.msk.bf16.mxu1 %vm2267_vm0, %v2265_v46 }
  0x77   : > { %1040 = vmatprep.mubr.bf16.mxu0 %v313_v52  ;;  %1009 = vmatpush1.bf16.msra.mxu0 %v2025_v6 }
  0x78   : > { %1010 = vmatprep.subr.bf16.mxu0 %v2030_v8 }
  0x7b   : > { %1011 = vmatpush1.bf16.msra.mxu0 %v2028_v9 }
  0x7c   : > { %1012 = vmatprep.subr.bf16.mxu0 %v2033_v10 }
  0x7f   : > { %1013 = vmatpush1.bf16.msra.mxu0 %v2031_v11 }
  0x80   : > { %1014 = vmatprep.subr.bf16.mxu0 %v2036_v12 }
  0x83   : > { %1015 = vmatpush1.bf16.msra.mxu0 %v2034_v13 }
  0x84   : > { %1016 = vmatprep.subr.bf16.mxu0 %v2039_v14 }
  0x87   : > { %1017 = vmatpush1.bf16.msra.mxu0 %v2037_v15 }
  0x88   : > { %1018 = vmatprep.subr.bf16.mxu0 %v2042_v16 }
  0x8b   : > { %1019 = vmatpush1.bf16.msra.mxu0 %v2040_v17 }
  0x8c   : > { %1020 = vmatprep.subr.bf16.mxu0 %v2045_v18 }
  0x8f   : > { %1021 = vmatpush1.bf16.msra.mxu0 %v2043_v19 }
  0x90   : > { %1022 = vmatprep.subr.bf16.mxu0 %v2048_v20 }
  0x93   : > { %1023 = vmatpush1.bf16.msra.mxu0 %v2046_v21 }
  0x94   : > { %1024 = vmatprep.subr.bf16.mxu0 %v2051_v22 }
  0x97   : > { %1025 = vmatpush2.bf16.msra.mxu0 %v2049_v23 }
  0x98   : > { %1026 = vmatprep.subr.bf16.mxu0 %v2054_v24 }
  0x9b   : > { %1027 = vmatpush2.bf16.msra.mxu0 %v2052_v25 }
  0x9c   : > { %1028 = vmatprep.subr.bf16.mxu0 %v2057_v26 }
  0x9f   : > { %1029 = vmatpush2.bf16.msra.mxu0 %v2055_v27 }
  0xa0   : > { %1030 = vmatprep.subr.bf16.mxu0 %v2060_v28 }
  0xa3   : > { %1031 = vmatpush2.bf16.msra.mxu0 %v2058_v29 }
  0xa4   : > { %1032 = vmatprep.subr.bf16.mxu0 %v2063_v30 }
  0xa7   : > { %1033 = vmatpush2.bf16.msra.mxu0 %v2061_v31 }
  0xa8   : > { %1034 = vmatprep.subr.bf16.mxu0 %v2066_v32 }
  0xab   : > { %1035 = vmatpush2.bf16.msra.mxu0 %v2064_v33 }
  0xac   : > { %1036 = vmatprep.subr.bf16.mxu0 %v2069_v36 }
  0xaf   : > { %1037 = vmatpush2.bf16.msra.mxu0 %v2067_v37 }
  0xb0   : > { %1038 = vmatprep.subr.bf16.mxu0 %v2072_v40 }
  0xb3   : > { %1039 = vmatpush2.bf16.msra.mxu0 %v2070_v42 }
  0xb4   : > { %1836 = vmatprep.subr.bf16.mxu0 %v2265_v46 }
  0xb6   : > { %1041 = vmatmul.mubr.bf16.vlgmr.msra.gmra.mxu0 %v2411_v5  ;;  %v1052_v5 = vld [vmem:[%s2538_s5 + $0x8] sm:$0xff] }
  0xb7   : > { %1838 = vmatprep.mubr.msk.bf16.mxu0 %vm2267_vm0, %v2265_v46 }
 0x135   : > { %v999_v45 = vpop.f32.mrf.mxu1 }
 0x136   : > { %v1000_v47 = vadd.f32 %v999_v45, %v423_v43  ;;  %v956_v49 = vpop.f32.mrf.mxu0  ;;  %v430_v45 = vsub.s32 4, %v2416_v35 }
 0x137   : > { %v1001_v50 = vpop.f32.mrf.mxu1  ;;  %v957_v1 = vadd.f32 %v956_v49, %v415_v61 }
 0x138   : > { %v1002_v51 = vadd.f32 %v1001_v50, %v427_v44  ;;  %1074 = vrot.lane.b32.xlu1 %v1000_v47, %s2266_s22  ;;  %v958_v52 = vpop.f32.mrf.mxu0  ;;  %v1072_v10 = vmul.f32 %v1051_v4, %v1000_v47  ;;  %v434_v47 = vsub.s32 5, %v2416_v35  ;;  %v431_v49 = vrot.slane %v2422_v39, %v430_v45  ;;  %v2082_v45 = vld [vmem:[#allocation5 + $0x40] ss:$8 sps:$4 sm:$0xff]  }
 0x139   : > { %v1003_v53 = vpop.f32.mrf.mxu1  ;;  %v959_v63 = vadd.f32 %v958_v52, %v419_v55  ;;  %v1062_v37 = vmul.f32 %v1051_v4, %v957_v1 }
 0x13a   : > { %v1004_v56 = vadd.f32 %v1003_v53, %v423_v43  ;;  %1208 = vrot.lane.b32.xlu0 %v1002_v51, %s2266_s22  ;;  %v960_v57 = vpop.f32.mrf.mxu0  ;;  %v1206_v14 = vmul.f32 %v1051_v4, %v1002_v51  ;;  %v435_v51 = vrot.slane %v2422_v39, %v434_v47  ;;  %v2087_v47 = vld [vmem:[#allocation5 + $0x34] ss:$8 sps:$4 sm:$0xff]  }
 0x13b   : > { %v1005_v58 = vpop.f32.mrf.mxu1  ;;  %v961_v0 = vadd.f32 %v960_v57, %v415_v61  ;;  %v1196_v26 = vmul.f32 %v1051_v4, %v959_v63 }
 0x13c   : > { %v1006_v59 = vadd.f32 %v1005_v58, %v427_v44  ;;  %1076 = vrot.lane.b32.xlu1 %v1004_v56, %s2266_s22  ;;  %v962_v60 = vpop.f32.mrf.mxu0  ;;  %v1073_v11 = vmul.f32 %v1052_v5, %v1004_v56 }
 0x13d   : > { %v963_v62 = vadd.f32 %v962_v60, %v419_v55  ;;  %v1063_v38 = vmul.f32 %v1052_v5, %v961_v0 }
 0x13e   : > { %1210 = vrot.lane.b32.xlu0 %v1006_v59, %s2266_s22  ;;  %v1207_v16 = vmul.f32 %v1052_v5, %v1006_v59 }
 0x13f   : > { %v1197_v27 = vmul.f32 %v1052_v5, %v963_v62 }
 0x140   : > { %1200 = vrot.lane.b32.xlu1 %v963_v62, %s2266_s22  ;;  %v1057_v62 = vadd.s32 8, %v2416_v35 }
 0x142   : > { %1198 = vrot.lane.b32.xlu0 %v959_v63, %s2266_s22 }
 0x144   : > { %1066 = vrot.lane.b32.xlu1 %v961_v0, %s2266_s22 }
 0x146   : > { %1064 = vrot.lane.b32.xlu0 %v957_v1, %s2266_s22  ;;  %s1596_s22 = sshll.u32 %s301_s21, 4  ;;  %s2486_s22 = int_to_ptr.vmem [resolvable:$true] %s1596_s22 }
 0x147   : > { %s2189_s17 = scalar_lea.vmem %s2486_s22, 512  ;;  %p2196_p11 = scmp.lt.s32.totalorder %s2486_s22, %s2194_s13 }
 0x148   : > { %p2190_p12 = scmp.ne.s32.totalorder %s2486_s22, %s2189_s17  ;;  %p2197_p0 = scmp.lt.s32.totalorder %s2195_s15, %s2189_s17 }
 0x14a   : > { %p2191_p7 = pnand %p2190_p12, %p2349_p5  ;;  %p2198_p1 = por %p2197_p0, %p2196_p11 }
 0x14c   : > { %p2192_p8 = pneg %p2191_p7 }
 0x14e   : > { %p2199_p3 = pnand %p2198_p1, %p2192_p8 }
 0x176   : > { %v1042_v50 = vpop.f32.mrf.mxu0 }
 0x177   : > { %v1043_v53 = vadd.f32 %v1042_v50, %v431_v49  ;;  %v2090_v50 = vld [vmem:[#allocation5 + $0x24] ss:$8 sps:$4 sm:$0xff]  }
 0x178   : > { %v1044_v52 = vpop.f32.mrf.mxu0 }
 0x179   : > { %v1045_v56 = vadd.f32 %v1044_v52, %v435_v51  ;;  %v2093_v52 = vld [vmem:[#allocation5 + $0x14] ss:$8 sps:$4 sm:$0xff]  }
 0x17a   : > { %v1046_v55 = vpop.f32.mrf.mxu0 }
 0x17b   : > { %v1047_v57 = vadd.f32 %v1046_v55, %v431_v49  ;;  %v2085_v49 = vld [vmem:[#allocation5 + $0x30] ss:$8 sps:$4 sm:$0xff]   ;;  %v2096_v55 = vld [vmem:[#allocation5 + $0x4] ss:$8 sps:$4 sm:$0xff]  }
 0x17c   : > { %v1048_v58 = vpop.f32.mrf.mxu0 }
 0x17d   : > { %v1147_v59 = vpack.c.bf16 %v1047_v57, %v1043_v53  ;;  %v1049_v60 = vadd.f32 %v1048_v58, %v435_v51  ;;  %v2088_v51 = vld [vmem:[#allocation5 + $0x20] ss:$8 sps:$4 sm:$0xff]   ;;  %v2091_v53 = vld [vmem:[#allocation5 + $0x10] ss:$8 sps:$4 sm:$0xff]   ;;  %v2099_v57 = vld [vmem:[#allocation5 + $0xf4] ss:$8 sps:$4 sm:$0xff]  }
 0x17e   : > { %v2097_v58 = vld [vmem:[#allocation5 + $0xf0] ss:$8 sps:$4 sm:$0xff]  }
 0x17f   : > { %v1280_v61 = vpack.c.bf16 %v1049_v60, %v1045_v56  ;;  %v2094_v56 = vld [vmem:[#allocation5] ss:$8 sps:$4 sm:$0xff]  }
 0x180   : > { %v2100_v60 = vld [vmem:[#allocation5 + $0xe0] ss:$8 sps:$4 sm:$0xff]  }
 0x1aa   : > { %v1075_v3 = vpop.permute.xlu1 %1074 }
 0x1ab   : > { %v1078_v8 = vmul.f32 %v1075_v3, %v1053_v2 }
 0x1ac   : > { %v1209_v6 = vpop.permute.xlu0 %1208 }
 0x1ad   : > { %v1212_v12 = vmul.f32 %v1209_v6, %v1053_v2  ;;  %v1080_v17 = vadd.f32 %v1078_v8, %v1072_v10 }
 0x1ae   : > { %v1077_v9 = vpop.permute.xlu1 %1076 }
 0x1af   : > { %v1079_v13 = vmul.f32 %v1077_v9, %v1054_v7  ;;  %v1214_v21 = vadd.f32 %v1212_v12, %v1206_v14 }
 0x1b0   : > { %v1211_v15 = vpop.permute.xlu0 %1210 }
 0x1b1   : > { %v1081_v18 = vadd.f32 %v1079_v13, %v1073_v11  ;;  %v1213_v19 = vmul.f32 %v1211_v15, %v1054_v7 }
 0x1b2   : > { %v1201_v20 = vpop.permute.xlu1 %1200 }
 0x1b3   : > { %v1083_v22 = vpack.c.bf16 %v1081_v18, %v1080_v17  ;;  %v1215_v23 = vadd.f32 %v1213_v19, %v1207_v16  ;;  %v1203_v24 = vmul.f32 %v1201_v20, %v1054_v7 }
 0x1b4   : > { %v1199_v25 = vpop.permute.xlu0 %1198 }
 0x1b5   : > { %v1217_v28 = vpack.c.bf16 %v1215_v23, %v1214_v21  ;;  %v1202_v29 = vmul.f32 %v1199_v25, %v1053_v2  ;;  %1837 = vmatpush3.bf16.xpose.msra.mxu0 %v1083_v22  ;;  %v1205_v31 = vadd.f32 %v1203_v24, %v1197_v27 }
 0x1b6   : > { %v1067_v30 = vpop.permute.xlu1 %1066  ;;  %1842 = vmatprep.subr.bf16.mxu0 %v2265_v46 }
 0x1b7   : > { %v1204_v32 = vadd.f32 %v1202_v29, %v1196_v26  ;;  %v1069_v33 = vmul.f32 %v1067_v30, %v1054_v7  ;;  %1849 = vmatpush3.bf16.xpose.msra.mxu1 %v1217_v28 }
 0x1b8   : > { %v1065_v36 = vpop.permute.xlu0 %1064  ;;  %1854 = vmatprep.subr.bf16.mxu1 %v2265_v46 }
 0x1b9   : > { %v1216_v40 = vpack.c.bf16 %v1205_v31, %v1204_v32  ;;  %v1068_v41 = vmul.f32 %v1065_v36, %v1053_v2  ;;  %v1071_v42 = vadd.f32 %v1069_v33, %v1063_v38  ;;  %v2073_v38 = vld [vmem:[#allocation5 + $0x70] ss:$8 sps:$4 sm:$0xff]  }
 0x1bb   : > { %v1070_v43 = vadd.f32 %v1068_v41, %v1062_v37  ;;  %v2075_v37 = vld [vmem:[#allocation5 + $0x74] ss:$8 sps:$4 sm:$0xff]   ;;  %v2076_v41 = vld [vmem:[#allocation5 + $0x60] ss:$8 sps:$4 sm:$0xff]  }
 0x1bd   : > { %v1082_v44 = vpack.c.bf16 %v1071_v42, %v1070_v43  ;;  %v2081_v42 = vld [vmem:[#allocation5 + $0x54] ss:$8 sps:$4 sm:$0xff]   ;;  %v2079_v43 = vld [vmem:[#allocation5 + $0x50] ss:$8 sps:$4 sm:$0xff]  }
 0x1be   : > { %1851 = vmatmul.mubr.bf16.vlgmr.msra.gmra.mxu1 %v1216_v40  ;;  %v2078_v40 = vld [vmem:[#allocation5 + $0x64] ss:$8 sps:$4 sm:$0xff]  }
 0x1bf   : > { %1839 = vmatmul.mubr.bf16.vlgmr.msra.gmra.mxu0 %v1082_v44  ;;  %1856 = vmatprep.mubr.msk.bf16.mxu1 %vm2267_vm0, %v2265_v46  ;;  %v2084_v44 = vld [vmem:[#allocation5 + $0x44] ss:$8 sps:$4 sm:$0xff]  }
 0x1c0   : > { %1844 = vmatprep.mubr.msk.bf16.mxu0 %vm2267_vm0, %v2265_v46  ;;  %1843 = vmatpush3.bf16.msra.mxu0 %v1147_v59  ;;  %v1059_v46 = vand.u32 127, %v412_v34  ;;  %v2102_v59 = vld [vmem:[#allocation5 + $0xe4] ss:$8 sps:$4 sm:$0xff]  }
 0x1c1   : > { %1855 = vmatpush3.bf16.msra.mxu1 %v1280_v61  ;;  %v2105_v61 = vld [vmem:[#allocation5 + $0xd4] ss:$8 sps:$4 sm:$0xff]  }
 0x1c2   : > { %vm1060_vm1 = vcmp.le.s32.totalorder %v1059_v46, %v2416_v35  ;;  %vm1061_vm3 = vcmp.le.s32.totalorder %v1059_v46, %v1057_v62  ;;  %1535 = vmatprep.subr.bf16.mxu1 %v2075_v37  ;;  %v2103_v46 = vld [vmem:[#allocation5 + $0xd0] ss:$8 sps:$4 sm:$0xff]   ;;  %v2108_v62 = vld [vmem:[#allocation5 + $0xc4] ss:$8 sps:$4 sm:$0xff]  }
 0x27e   : > { %v1252_v63 = vpop.f32.mrf.mxu1 }
 0x27f   : > { %v1259_v39 = vsel %vm1060_vm1, %v1252_v63, -1e+30  ;;  %v1118_v0 = vpop.f32.mrf.mxu0  ;;  %v2106_v63 = vld [vmem:[#allocation5 + $0xc0] ss:$8 sps:$4 sm:$0xff]  }
 0x280   : > { %v1852_v1 = vpop.f32.mrf.mxu1  ;;  %v1261_v2 = vsel %vm1127_vm2, %v1259_v39, -inf  ;;  %v1125_v3 = vsel %vm1060_vm1, %v1118_v0, -1e+30  ;;  %v2109_v0 = vld [vmem:[#allocation5 + $0xb0] ss:$8 sps:$4 sm:$0xff]  }
 0x281   : > { %1262 = vmax.xlane.f32.xlu0 %v1261_v2  ;;  %v1840_v4 = vpop.f32.mrf.mxu0  ;;  %v1128_v9 = vsel %vm1127_vm2, %v1125_v3, -inf  ;;  %v2114_v1 = vld [vmem:[#allocation5 + $0xa4] ss:$8 sps:$4 sm:$0xff]   ;;  %v2112_v2 = vld [vmem:[#allocation5 + $0xa0] ss:$8 sps:$4 sm:$0xff]  }
 0x282   : > { %v1255_v5 = vpop.f32.mrf.mxu1  ;;  %v2115_v4 = vld [vmem:[#allocation5 + $0x90] ss:$8 sps:$4 sm:$0xff]  }
 0x283   : > { %v1260_v6 = vsel %vm1061_vm3, %v1255_v5, -1e+30  ;;  %v1121_v7 = vpop.f32.mrf.mxu0  ;;  %v2120_v5 = vld [vmem:[#allocation5 + $0x84] ss:$8 sps:$4 sm:$0xff]  }
 0x284   : > { %v1853_v8 = vpop.f32.mrf.mxu1  ;;  %v1264_v34 = vsel %vm1127_vm2, %v1260_v6, -inf  ;;  %v1126_v10 = vsel %vm1061_vm3, %v1121_v7, -1e+30 }
 0x285   : > { %1265 = vmax.xlane.f32.xlu1 %v1264_v34  ;;  %1129 = vmax.xlane.f32.xlu0 %v1128_v9  ;;  %v1841_v11 = vpop.f32.mrf.mxu0  ;;  %v1131_v12 = vsel %vm1127_vm2, %v1126_v10, -inf }
 0x289   : > { %1132 = vmax.xlane.f32.xlu0 %v1131_v12 }
 0x30a   : > { %v1263_v13 = vpop.xlane.xlu0 %1262 }
 0x30b   : > { %v1267_v14 = vsub.f32 %v1259_v39, %v1263_v13  ;;  %v2111_v39 = vld [vmem:[#allocation5 + $0xb4] ss:$8 sps:$4 sm:$0xff]  }
 0x30d   : > { %v1269_v15 = vmul.f32 1.442695, %v1267_v14 }
 0x30e   : > { %v1266_v16 = vpop.xlane.xlu1 %1265  ;;  %v1130_v17 = vpop.xlane.xlu0 %1129 }
 0x30f   : > { %2121 = vpow2.f32 %v1269_v15  ;;  %v1268_v18 = vsub.f32 %v1260_v6, %v1266_v16  ;;  %v1134_v19 = vsub.f32 %v1125_v3, %v1130_v17  ;;  %v2117_v3 = vld [vmem:[#allocation5 + $0x94] ss:$8 sps:$4 sm:$0xff]   ;;  %v2118_v6 = vld [vmem:[#allocation5 + $0x80] ss:$8 sps:$4 sm:$0xff]  }
 0x311   : > { %v1271_v20 = vmul.f32 1.442695, %v1268_v18  ;;  %v1136_v21 = vmul.f32 1.442695, %v1134_v19 }
 0x312   : > { %v1133_v22 = vpop.xlane.xlu0 %1132 }
 0x313   : > { %2123 = vpow2.f32 %v1271_v20  ;;  %v1135_v23 = vsub.f32 %v1126_v10, %v1133_v22 }
 0x314   : > { %2125 = vpow2.f32 %v1136_v21 }
 0x315   : > { %v1138_v24 = vmul.f32 1.442695, %v1135_v23 }
 0x317   : > { %2127 = vpow2.f32 %v1138_v24 }
 0x31c   : > { %v2122_v25 = vpop.eup %2121 }
 0x31d   : > { %v1273_v26 = vsel %vm1127_vm2, %v2122_v25, 0.0 }
 0x31e   : > { %1274 = vadd.xlane.f32.xlu1 %v1273_v26 }
 0x320   : > { %v2124_v27 = vpop.eup %2123 }
 0x321   : > { %v2126_v28 = vpop.eup %2125  ;;  %v1276_v29 = vsel %vm1127_vm2, %v2124_v27, 0.0  ;;  %v1279_v30 = vpack.c.bf16 %v2124_v27, %v2122_v25 }
 0x322   : > { %v1140_v31 = vsel %vm1127_vm2, %v2126_v28, 0.0  ;;  %1277 = vadd.xlane.f32.xlu0 %v1276_v29 }
 0x323   : > { %1141 = vadd.xlane.f32.xlu1 %v1140_v31  ;;  %1857 = vmatmul.mubr.msk.bf16.vlgmr.msra.gmra.mxu1 %vm1127_vm2, %v1279_v30 }
 0x324   : > { %v2128_v32 = vpop.eup %2127  ;;  %1536 = vmatpush1.bf16.msra.mxu1 %v2073_v38 }
 0x325   : > { %v1143_v33 = vsel %vm1127_vm2, %v2128_v32, 0.0  ;;  %v1146_v36 = vpack.c.bf16 %v2128_v32, %v2126_v28  ;;  %1537 = vmatprep.subr.bf16.mxu1 %v2078_v40  ;;  %v1363_v28 = vld [vmem:[%s2537_s4] sm:$0x3] }
 0x326   : > { %1144 = vadd.xlane.f32.xlu0 %v1143_v33  ;;  %v1368_v29 = vrot.slane %v1363_v28, %v414_v54  ;;  %v1372_v30 = vrot.slane %v1363_v28, %v418_v48 }
 0x327   : > { %1845 = vmatmul.mubr.msk.bf16.vlgmr.msra.gmra.mxu0 %vm1127_vm2, %v1146_v36 }
 0x328   : > { %1538 = vmatpush1.bf16.msra.mxu1 %v2076_v41 }
 0x329   : > { %1539 = vmatprep.subr.bf16.mxu1 %v2081_v42 }
 0x32c   : > { %1540 = vmatpush1.bf16.msra.mxu1 %v2079_v43 }
 0x32d   : > { %1541 = vmatprep.subr.bf16.mxu1 %v2084_v44 }
 0x330   : > { %1542 = vmatpush1.bf16.msra.mxu1 %v2082_v45 }
 0x331   : > { %1543 = vmatprep.subr.bf16.mxu1 %v2087_v47 }
 0x334   : > { %1544 = vmatpush1.bf16.msra.mxu1 %v2085_v49 }
 0x335   : > { %1545 = vmatprep.subr.bf16.mxu1 %v2090_v50 }
 0x338   : > { %1546 = vmatpush1.bf16.msra.mxu1 %v2088_v51 }
 0x339   : > { %1547 = vmatprep.subr.bf16.mxu1 %v2093_v52 }
 0x33c   : > { %1548 = vmatpush1.bf16.msra.mxu1 %v2091_v53 }
 0x33d   : > { %1549 = vmatprep.subr.bf16.mxu1 %v2096_v55 }
 0x340   : > { %1550 = vmatpush1.bf16.msra.mxu1 %v2094_v56 }
 0x341   : > { %1551 = vmatprep.subr.bf16.mxu1 %v2099_v57 }
 0x344   : > { %1552 = vmatpush2.bf16.msra.mxu1 %v2097_v58 }
 0x345   : > { %1553 = vmatprep.subr.bf16.mxu1 %v2102_v59 }
 0x348   : > { %1554 = vmatpush2.bf16.msra.mxu1 %v2100_v60 }
 0x349   : > { %1555 = vmatprep.subr.bf16.mxu1 %v2105_v61 }
 0x34c   : > { %1556 = vmatpush2.bf16.msra.mxu1 %v2103_v46 }
 0x34d   : > { %1557 = vmatprep.subr.bf16.mxu1 %v2108_v62 }
 0x350   : > { %1558 = vmatpush2.bf16.msra.mxu1 %v2106_v63 }
 0x351   : > { %1559 = vmatprep.subr.bf16.mxu1 %v2111_v39 }
 0x354   : > { %1560 = vmatpush2.bf16.msra.mxu1 %v2109_v0 }
 0x355   : > { %1561 = vmatprep.subr.bf16.mxu1 %v2114_v1 }
 0x358   : > { %1562 = vmatpush2.bf16.msra.mxu1 %v2112_v2 }
 0x359   : > { %1563 = vmatprep.subr.bf16.mxu1 %v2117_v3 }
 0x35c   : > { %1564 = vmatpush2.bf16.msra.mxu1 %v2115_v4 }
 0x35d   : > { %1565 = vmatprep.subr.bf16.mxu1 %v2120_v5 }
 0x360   : > { %1566 = vmatpush2.bf16.msra.mxu1 %v2118_v6 }
 0x3a7   : > { %v1275_v7 = vpop.xlane.xlu1 %1274 }
 0x3a8   : > { %2129 = vrcp.f32 %v1275_v7 }
 0x3ab   : > { %v1278_v8 = vpop.xlane.xlu0 %1277 }
 0x3ac   : > { %v1142_v34 = vpop.xlane.xlu1 %1141  ;;  %2131 = vrcp.f32 %v1278_v8 }
 0x3ad   : > { %2133 = vrcp.f32 %v1142_v34 }
 0x3af   : > { %v1145_v9 = vpop.xlane.xlu0 %1144 }
 0x3b0   : > { %2135 = vrcp.f32 %v1145_v9 }
 0x3b5   : > { %v2130_v12 = vpop.eup %2129 }
 0x3b9   : > { %v2132_v13 = vpop.eup %2131 }
 0x3ba   : > { %v2134_v20 = vpop.eup %2133 }
 0x3bd   : > { %v2136_v22 = vpop.eup %2135 }
 0x3e3   : > { %v1318_v10 = vpop.f32.mrf.mxu1 }
 0x3e4   : > { %v1327_v16 = vmul.f32 %v2130_v12, %v1318_v10 }
 0x3e5   : > { %v1858_v11 = vpop.f32.mrf.mxu1 }
 0x3e7   : > { %v1185_v14 = vpop.f32.mrf.mxu0  ;;  %v1321_v15 = vpop.f32.mrf.mxu1 }
 0x3e8   : > { %v1328_v17 = vmul.f32 %v2132_v13, %v1321_v15  ;;  %v1194_v24 = vmul.f32 %v2134_v20, %v1185_v14 }
 0x3e9   : > { %v1846_v18 = vpop.f32.mrf.mxu0  ;;  %v1859_v19 = vpop.f32.mrf.mxu1 }
 0x3ea   : > { %v1330_v21 = vpack.c.bf16 %v1328_v17, %v1327_v16 }
 0x3eb   : > { %v1188_v23 = vpop.f32.mrf.mxu0 }
 0x3ec   : > { %v1195_v25 = vmul.f32 %v2136_v22, %v1188_v23  ;;  %1567 = vmatprep.mubr.bf16.mxu1 %v1330_v21 }
 0x3ed   : > { %v1847_v26 = vpop.f32.mrf.mxu0 }
 0x3ee   : > { %v1329_v27 = vpack.c.bf16 %v1195_v25, %v1194_v24 }
 0x3f0   : > { %1568 = vmatmul.mubr.bf16.vlgmr.msra.gmra.mxu1 %v1329_v27 }
 0x4b0   : > { %v1569_v31 = vpop.f32.mrf.mxu1 }
 0x4b1   : > { %v1570_v32 = vadd.f32 %v1569_v31, %v1368_v29 }
 0x4b2   : > { %v1571_v33 = vpop.f32.mrf.mxu1 }
 0x4b3   : > { %1578 = vst [vmem:[%s301_s21] sm:$0xff] %v1570_v32  ;;  %v1572_v36 = vadd.f32 %v1571_v33, %v1372_v30 }
 0x4b4   : > { %v1573_v37 = vpop.f32.mrf.mxu1 }
 0x4b5   : > { %1579 = vst [vmem:[%s301_s21 + $0x8] sm:$0xff] %v1572_v36  ;;  %v1574_v38 = vadd.f32 %v1573_v37, %v1368_v29 }
 0x4b6   : > { %v1575_v54 = vpop.f32.mrf.mxu1 }
 0x4b7   : > { %1580 = vst [vmem:[%s301_s21 + $0x10] sm:$0xff] %v1574_v38  ;;  %v1576_v35 = vadd.f32 %v1575_v54, %v1372_v30 }
 0x4b9   : > { %1581 = vst [vmem:[%s301_s21 + $0x18] sm:$0xff] %v1576_v35 }
 0x4ba   : > { %2202 = shalt.err (!%p2199_p3)
}
 0x4bb   : > { %s2203_s16 = scalar_lea.hbm %s2491_s9, 512  ;;  %s2207_s20 = scalar_lea.hbm %s2540_s7, 1024 }
 0x4bc   : > { %p2204_p2 = scmp.ne.s32.totalorder %s2491_s9, %s2203_s16  ;;  %p2208_p6 = scmp.lt.s32.totalorder %s2491_s9, %s2540_s7 }
 0x4bd   : > { %p2209_p9 = scmp.lt.s32.totalorder %s2207_s20, %s2203_s16 }
 0x4be   : > { %p2205_p4 = pnand %p2204_p2, %p2349_p5 }
 0x4bf   : > { %p2210_p10 = por %p2209_p9, %p2208_p6 }
 0x4c0   : > { %p2206_p13 = pneg %p2205_p4 }
 0x4c2   : > { %p2211_p12 = pnand %p2210_p10, %p2206_p13 }
 0x4c4   : > { %2214 = shalt.err (!%p2211_p12)
}
 0x4c5   : > { %s2269_s29 = smov 256   ;;  %s2270_s8 = smov 16  }
 0x4c6   : > { %1868 = dma.vmem_to_hbm [thread:$0]  (%p2349_p5), %s2486_s22, 512, %s2491_s9, %s2493_s14, %s2269_s29, %s2269_s29, %s2270_s8  }
 0x4c7 PF: > { %p1885_p7 = scmp.ge.s32.totalorder %s2257_s27, 2  ;;  %s1611_s17 = sand.u32 1, %s2245_s24  }
 0x4c8   : > { %p2550_p8 = scmp.ne.s32.totalorder %s2543_s12, 0  ;;  %s1612_s28 = scalar_lea.sflag [#allocation4], %s1611_s17 }
 0x4ca   : > { %p1878_p11 = pnand %p1885_p7, %p2550_p8 }
 0x4cc   : > { %p1879_p0 = pneg %p1878_p11 }
 0x4ce   : > { %2240 = dma.done.wait (%p1879_p0), %s1612_s28, 512  }
 0x4cf   : > { %2242 = vsyncadd (%p1879_p0), %s1612_s28, 4294966784  ;;  %p19_p1 = scmp.ge.s32.totalorder %s2336_s30, 4   ;;  %s2551_s24 = smov %s2249_s25 }
 0x4d0   : > { %s2552_s25 = smov %s2253_s26  ;;  %s2553_s26 = smov %s2347_s10 }
 0x4d1   : > { %s2554_s27 = smov %s2336_s30  ;;  %21 = sbr.rel (!%p19_p1) target bundleno = 5 (0x5), region = 92 }
 0x4d6   :  { %1617 = vsyncpa [#allocation3], 1 }
 0x4d7   :  { %1619 = vsyncpa [#allocation3 + $0x1], 1 }
 0x4d8   :  { %1620 = vsyncpa [#allocation6], 1 }
 0x4d9   :  { %1621 = vsyncpa [#allocation4], 1 }
 0x4da   :  { %1623 = vsyncpa [#allocation4 + $0x1], 1 }

</bundles_post_ra>
